<compile_context>
chip_gen: v7x
topology: tpu7x:2x2x1
jax: 0.10.0
libtpu: 0.0.40
codegen_flags: <defaults>
</compile_context>

<pallas_src>
import jax
import jax.numpy as jnp
from jax.experimental import pallas as pl
from jax.experimental.pallas import tpu as pltpu

_LANE = 128
_SUBLANE = 8


def _round_up(a, b):
    return (a + b - 1) // b * b


def _vmem_capacity_bytes():
    """Per-TensorCore VMEM capacity; fall back to the v7x size (the smallest)."""
    try:
        info = pltpu.get_tpu_info()
        cap = getattr(info, "vmem_capacity_bytes", None)
        if cap:
            return int(cap)
    except Exception:
        pass
    return 64 * 1024 * 1024


# --------------------------------------------------------------------------------------
# Kernels
# --------------------------------------------------------------------------------------

def _dwconv_split_kernel(x_ref, halo_ref, wdw_ref, wpwt_ref, bpw_ref, o_ref, ext_ref):
    """Large-D path: depthwise taps as VPU FMAs, then a (T, D) x (D, D) MXU matmul.

    x_ref    : (1, T_TILE, D)     current sequence tile
    halo_ref : (1, 1, HALO, D)    last HALO rows of the previous tile (zeros for tile 0)
    wdw_ref  : (K, D)  f32        depthwise weights, wdw[k, c] = torch_w_dw[c, 0, k]
    wpwt_ref : (D, D)             pointwise weights transposed: wpwt[c, o] = torch_w_pw[o, c, 0]
    bpw_ref  : (1, D)  f32        fused bias: b_pw + W_pw @ b_dw
    o_ref    : (1, T_TILE, D)     output tile
    ext_ref  : (HALO + T_TILE, D) scratch (input dtype): halo rows followed by the tile
    """
    t_tile = x_ref.shape[1]
    K = wdw_ref.shape[0]
    halo = halo_ref.shape[2]

    x = x_ref[0]                                              # (T_TILE, D), input dtype

    # Stage halo + current tile contiguously (both stores sublane-aligned).
    ext_ref[pl.ds(0, halo), :] = halo_ref[0, 0]
    ext_ref[pl.ds(halo, t_tile), :] = x

    # Causal depthwise conv, unrolled over small static K (f32 accumulation).
    acc = x.astype(jnp.float32) * wdw_ref[K - 1, :][None, :]
    base = halo - (K - 1)                                     # first needed scratch row
    for k in range(K - 1):
        tap = ext_ref[pl.ds(base + k, t_tile), :].astype(jnp.float32)
        acc = acc + tap * wdw_ref[k, :][None, :]

    # Pointwise (1x1) conv == channel-mixing matmul on the MXU (f32 accumulate).
    out = jnp.dot(acc.astype(wpwt_ref.dtype), wpwt_ref[...],
                  preferred_element_type=jnp.float32)
    out = out + bpw_ref[0, :][None, :]
    o_ref[0] = out.astype(o_ref.dtype)


def _dwconv_fused_kernel(x_ref, halo_ref, wf_ref, bpw_ref, o_ref, ext_ref):
    """Small-D path: depthwise taps folded into one (T, K*D) x (K*D, D) MXU contraction.

    wf_ref : (K*D, D)  fused weights: wf[k*D + c, o] = wdw[k, c] * wpw[o, c]
    """
    t_tile = x_ref.shape[1]
    halo = halo_ref.shape[2]
    d = x_ref.shape[2]
    K = wf_ref.shape[0] // d

    x = x_ref[0]                                              # (T_TILE, D), input dtype

    ext_ref[pl.ds(0, halo), :] = halo_ref[0, 0]
    ext_ref[pl.ds(halo, t_tile), :] = x

    base = halo - (K - 1)
    taps = [ext_ref[pl.ds(base + k, t_tile), :] for k in range(K - 1)] + [x]
    xt = jnp.concatenate(taps, axis=-1).astype(wf_ref.dtype)  # (T_TILE, K*D), lane-aligned

    out = jnp.dot(xt, wf_ref[...], preferred_element_type=jnp.float32)
    out = out + bpw_ref[0, :][None, :]
    o_ref[0] = out.astype(o_ref.dtype)


# --------------------------------------------------------------------------------------
# Wrapper
# --------------------------------------------------------------------------------------

def causal_depthwise_conv1d(x, w_dw, b_dw, w_pw, b_pw, *, t_tile=512, fuse_taps=None):
    """x: (B, T, D).  Weights in PyTorch Conv1d layout:
       w_dw (D,1,K), b_dw (D,), w_pw (D,D,1), b_pw (D,).  Returns (B, T, D)."""
    B, T, D = x.shape
    K = w_dw.shape[-1]

    # ---------------- tile / padding choices ----------------
    halo = _round_up(max(K - 1, 1), _SUBLANE)            # sublane-aligned halo >= K-1
    d_pad = _round_up(D, _LANE)                           # == D if already lane-dense
    min_tile = max(halo, _SUBLANE)

    t_req = max(int(t_tile), min_tile)
    t_tile = min(_round_up(t_req, _SUBLANE), _round_up(T, _SUBLANE))
    t_tile = max(t_tile, min_tile)

    mm_dtype = jnp.bfloat16 if x.dtype == jnp.bfloat16 else jnp.float32
    fuse = (d_pad <= 256) if fuse_taps is None else bool(fuse_taps)

    bytes_x = jnp.dtype(x.dtype).itemsize
    bytes_mm = jnp.dtype(mm_dtype).itemsize
    if fuse:
        w_bytes = K * d_pad * d_pad * bytes_mm + d_pad * 4
    else:
        w_bytes = K * d_pad * 4 + d_pad * d_pad * bytes_mm + d_pad * 4

    def _vmem_bytes(tt, weight_bufs):
        # double-buffered streaming blocks (in tile, halo tile, out tile) + weights + scratch
        stream = 2 * (tt * d_pad + halo * d_pad + tt * d_pad) * bytes_x
        scratch = (halo + tt) * d_pad * bytes_x
        return stream + scratch + weight_bufs * w_bytes

    cap = _vmem_capacity_bytes()
    # Shrink the sequence tile until the (worst-case, double-buffered-weights) footprint
    # fits comfortably on the smallest-VMEM generation we might be running on.
    while t_tile > min_tile and _vmem_bytes(t_tile, 2) > int(cap * 0.7):
        t_tile = max(min_tile, _round_up(t_tile // 2, _SUBLANE))

    num_t = pl.cdiv(T, t_tile)
    # v7x megacore: keep at least 2 grid steps when batch == 1 and the sequence allows it.
    if B * num_t < 2 and T > min_tile:
        t_tile = max(min_tile, _round_up(pl.cdiv(T, 2), _SUBLANE))
        num_t = pl.cdiv(T, t_tile)

    vmem_limit = int(min(cap, max(_vmem_bytes(t_tile, 2) + 8 * 1024 * 1024,
                                  32 * 1024 * 1024)))

    # ---------------- host-side glue (no T pad, channel pad only if needed) ------------
    x_c = x if d_pad == D else jnp.pad(x, ((0, 0), (0, 0), (0, d_pad - D)))

    if num_t > 1:
        lead = x_c[:, : (num_t - 1) * t_tile, :].reshape(B, num_t - 1, t_tile, d_pad)
        tails = lead[:, :, t_tile - halo:, :]                 # last HALO rows of each full tile
        halo_arr = jnp.concatenate(
            [jnp.zeros((B, 1, halo, d_pad), x_c.dtype), tails], axis=1)
    else:
        halo_arr = jnp.zeros((B, 1, halo, d_pad), x_c.dtype)

    wdw_k = jnp.pad(jnp.transpose(w_dw[:, 0, :], (1, 0)).astype(jnp.float32),
                    ((0, 0), (0, d_pad - D)))                                  # (K, d_pad)
    wpwt_f32 = jnp.pad(jnp.transpose(w_pw[:, :, 0], (1, 0)).astype(jnp.float32),
                       ((0, d_pad - D), (0, d_pad - D)))                        # (d_pad, d_pad)
    # Fold the depthwise bias through the (linear) pointwise conv.
    b_fused = (b_pw.astype(jnp.float32)
               + w_pw[:, :, 0].astype(jnp.float32) @ b_dw.astype(jnp.float32))
    bpw_k = jnp.pad(b_fused, (0, d_pad - D)).reshape(1, d_pad)                  # (1, d_pad)

    if fuse:
        # wf[k*d_pad + c, o] = wdw[k, c] * wpw[o, c]
        wf = (wdw_k[:, :, None] * wpwt_f32[None, :, :]).reshape(K * d_pad, d_pad)
        weight_args = (wf.astype(mm_dtype), bpw_k)
        kernel_fn = _dwconv_fused_kernel
    else:
        weight_args = (wdw_k, wpwt_f32.astype(mm_dtype), bpw_k)
        kernel_fn = _dwconv_split_kernel

    flops = 2 * B * T * d_pad * d_pad + 2 * K * B * T * d_pad
    bytes_accessed = (int(x_c.size) + int(halo_arr.size)) * bytes_x \
        + sum(int(w.size) * jnp.dtype(w.dtype).itemsize for w in weight_args) \
        + B * T * d_pad * bytes_x
    cost = pl.CostEstimate(flops=int(flops), transcendentals=0,
                           bytes_accessed=int(bytes_accessed))

    def _const_spec(shape, single_buffer):
        idx = lambda b, t, n=len(shape): (0,) * n
        if single_buffer:
            return pl.BlockSpec(shape, idx, pipeline_mode=pl.Buffered(1))
        return pl.BlockSpec(shape, idx)

    def _build(single_buffer):
        in_specs = [
            pl.BlockSpec((1, t_tile, d_pad), lambda b, t: (b, t, 0)),
            pl.BlockSpec((1, 1, halo, d_pad), lambda b, t: (b, t, 0, 0)),
        ] + [_const_spec(tuple(w.shape), single_buffer) for w in weight_args]
        return pl.pallas_call(
            kernel_fn,
            out_shape=jax.ShapeDtypeStruct((B, T, d_pad), x.dtype),
            grid_spec=pltpu.PrefetchScalarGridSpec(
                num_scalar_prefetch=0,
                grid=(B, num_t),
                in_specs=in_specs,
                out_specs=pl.BlockSpec((1, t_tile, d_pad), lambda b, t: (b, t, 0)),
                scratch_shapes=[pltpu.VMEM((halo + t_tile, d_pad), x.dtype)],
            ),
            compiler_params=pltpu.CompilerParams(
                dimension_semantics=("parallel", "parallel"),
                vmem_limit_bytes=vmem_limit,
            ),
            cost_estimate=cost,
        )

    args = (x_c, halo_arr) + weight_args
    try:
        y = _build(single_buffer=True)(*args)
    except Exception:
        # Fallback if this jax build does not accept pipeline_mode=pl.Buffered(1);
        # identical kernel, just double-buffered constant weights (more VMEM).
        y = _build(single_buffer=False)(*args)

    return y if d_pad == D else y[:, :, :D]


# --------------------------------------------------------------------------------------
# Pure-JAX reference (mirrors the PyTorch forward exactly)
# --------------------------------------------------------------------------------------

def _reference(x, w_dw, b_dw, w_pw, b_pw):
    B, T, D = x.shape
    K = w_dw.shape[-1]
    xt = jnp.transpose(x, (0, 2, 1)).astype(jnp.float32)     # (B, D, T)
    xp = jnp.pad(xt, ((0, 0), (0, 0), (K - 1, 0)))           # causal left pad
    dw = jnp.zeros((B, D, T), jnp.float32)
    for k in range(K):
        dw = dw + xp[:, :, k:k + T] * w_dw[None, :, 0, k, None]
    dw = dw + b_dw[None, :, None]
    pw = jnp.einsum("oc,bct->bot", w_pw[:, :, 0], dw) + b_pw[None, :, None]
    return jnp.transpose(pw, (0, 2, 1))                      # (B, T, D)


if __name__ == "__main__":
    root = jax.random.PRNGKey(0)

    def run_case(key, B, T, D, K, t_tile, dtype=jnp.float32, atol=1e-5, rtol=1e-5):
        kx, kwdw, kbdw, kwpw, kbpw = jax.random.split(key, 5)
        x = jax.random.normal(kx, (B, T, D), dtype=jnp.float32)
        # PyTorch Conv1d(dim, dim, kernel_size=K, groups=dim): weight (D,1,K), bias (D,)
        w_dw = jax.random.normal(kwdw, (D, 1, K), dtype=jnp.float32) * 0.1
        b_dw = jax.random.normal(kbdw, (D,), dtype=jnp.float32) * 0.1
        # PyTorch Conv1d(dim, dim, kernel_size=1): weight (D,D,1), bias (D,)
        w_pw = jax.random.normal(kwpw, (D, D, 1), dtype=jnp.float32) * 0.1
        b_pw = jax.random.normal(kbpw, (D,), dtype=jnp.float32) * 0.1

        y = jax.block_until_ready(
            causal_depthwise_conv1d(x.astype(dtype), w_dw, b_dw, w_pw, b_pw, t_tile=t_tile))
        y_ref = _reference(x, w_dw, b_dw, w_pw, b_pw)
        assert y.shape == (B, T, D)
        assert jnp.allclose(y.astype(jnp.float32), y_ref, atol=atol, rtol=rtol), \
            "mismatch vs reference"

    k1, k2, k3, k4 = jax.random.split(root, 4)
    # Case 1: tiny single-tile shape, small-D fused-matmul path, channel padding.
    run_case(k1, B=2, T=8, D=32, K=3, t_tile=512)
    # Case 2: multiple tiles + ragged last tile + K=4 halo, fused path.
    run_case(k2, B=2, T=40, D=32, K=4, t_tile=16)
    # Case 3: larger D -> split (FMA + DxD matmul) path, no channel pad, B=1 grid split.
    run_case(k3, B=1, T=40, D=384, K=3, t_tile=512)
    # Case 4: bf16 inputs -> bf16 staging scratch + bf16 MXU matmul (loose tolerance).
    run_case(k4, B=2, T=24, D=128, K=3, t_tile=512, dtype=jnp.bfloat16, atol=5e-2, rtol=5e-2)

    print("KERNEL_OK")
</pallas_src>

<mosaic_0001>
module attributes {stable_mosaic.version = 11 : i64} {
  func.func @_dwconv_fused_kernel(%arg0: i32, %arg1: i32, %arg2: memref<1x8x128xf32, #tpu.memory_space<vmem>>, %arg3: memref<1x1x8x128xf32, #tpu.memory_space<vmem>>, %arg4: memref<384x128xf32, #tpu.memory_space<vmem>>, %arg5: memref<1x128xf32, #tpu.memory_space<vmem>>, %arg6: memref<1x8x128xf32, #tpu.memory_space<vmem>>, %arg7: memref<16x128xf32, #tpu.memory_space<vmem>>) attributes {dimension_semantics = [#tpu.dimension_semantics<parallel>, #tpu.dimension_semantics<parallel>], iteration_bounds = array<i64: 2, 1>, scalar_prefetch = 0 : i64, scratch_operands = 1 : i64, tpu.core_type = #tpu.core_type<tc>, window_params = [{transform_indices = @transform_0, window_bounds = array<i64: 1, 8, 128>}, {transform_indices = @transform_1, window_bounds = array<i64: 1, 1, 8, 128>}, {pipeline_mode = #tpu.pipeline_mode<synchronous>, transform_indices = @transform_2, window_bounds = array<i64: 384, 128>}, {pipeline_mode = #tpu.pipeline_mode<synchronous>, transform_indices = @transform_3, window_bounds = array<i64: 1, 128>}, {transform_indices = @transform_4, window_bounds = array<i64: 1, 8, 128>}]} {
    %c0 = arith.constant 0 : index
    %c0_0 = arith.constant 0 : index
    %c0_1 = arith.constant 0 : index
    %0 = vector.load %arg2[%c0, %c0_0, %c0_1] : memref<1x8x128xf32, #tpu.memory_space<vmem>>, vector<1x8x128xf32>
    %1 = vector.shape_cast %0 : vector<1x8x128xf32> to vector<8x128xf32>
    %c0_2 = arith.constant 0 : index
    %c0_3 = arith.constant 0 : index
    %c0_4 = arith.constant 0 : index
    %c0_5 = arith.constant 0 : index
    %2 = vector.load %arg3[%c0_2, %c0_3, %c0_4, %c0_5] : memref<1x1x8x128xf32, #tpu.memory_space<vmem>>, vector<1x1x8x128xf32>
    %3 = vector.shape_cast %2 : vector<1x1x8x128xf32> to vector<8x128xf32>
    %c0_6 = arith.constant 0 : index
    %c0_7 = arith.constant 0 : index
    %4 = vector.load %arg7[%c0_6, %c0_7] : memref<16x128xf32, #tpu.memory_space<vmem>>, vector<8x128xf32>
    tpu.vector_store %arg7[%c0_6, %c0_7], %3 {strides = array<i32>} : memref<16x128xf32, #tpu.memory_space<vmem>>, vector<8x128xf32>,
    %c8 = arith.constant 8 : index
    %c0_8 = arith.constant 0 : index
    %5 = vector.load %arg7[%c8, %c0_8] : memref<16x128xf32, #tpu.memory_space<vmem>>, vector<8x128xf32>
    tpu.vector_store %arg7[%c8, %c0_8], %1 {strides = array<i32>} : memref<16x128xf32, #tpu.memory_space<vmem>>, vector<8x128xf32>,
    %c6 = arith.constant 6 : index
    %c0_9 = arith.constant 0 : index
    %6 = vector.load %arg7[%c6, %c0_9] : memref<16x128xf32, #tpu.memory_space<vmem>>, vector<8x128xf32>
    %c7 = arith.constant 7 : index
    %c0_10 = arith.constant 0 : index
    %7 = vector.load %arg7[%c7, %c0_10] : memref<16x128xf32, #tpu.memory_space<vmem>>, vector<8x128xf32>
    %8 = tpu.concatenate %6, %7, %1 in 1 : vector<8x128xf32>, vector<8x128xf32>, vector<8x128xf32> -> vector<8x384xf32>
    %c0_11 = arith.constant 0 : index
    %c0_12 = arith.constant 0 : index
    %9 = vector.load %arg4[%c0_11, %c0_12] : memref<384x128xf32, #tpu.memory_space<vmem>>, vector<384x128xf32>
    %cst = arith.constant dense<0.000000e+00> : vector<8x128xf32>
    %10 = tpu.matmul %8, %9, %cst {dimension_numbers = #tpu.dot_dimension_numbers<[1], [0], [0], [1], [0, 0, 1, 1], [], []>} : vector<8x384xf32>, vector<384x128xf32>, vector<8x128xf32> -> vector<8x128xf32>
    %c0_13 = arith.constant 0 : index
    %c0_14 = arith.constant 0 : index
    %11 = vector.load %arg5[%c0_13, %c0_14] : memref<1x128xf32, #tpu.memory_space<vmem>>, vector<1x128xf32>
    %12 = vector.shape_cast %11 : vector<1x128xf32> to vector<128xf32>
    %13 = vector.shape_cast %12 : vector<128xf32> to vector<1x128xf32>
    %14 = vector.broadcast %13 : vector<1x128xf32> to vector<8x128xf32>
    %15 = arith.addf %10, %14 : vector<8x128xf32>
    %c0_15 = arith.constant 0 : index
    %c0_16 = arith.constant 0 : index
    %c0_17 = arith.constant 0 : index
    %16 = vector.load %arg6[%c0_15, %c0_16, %c0_17] : memref<1x8x128xf32, #tpu.memory_space<vmem>>, vector<1x8x128xf32>
    %17 = vector.shape_cast %16 : vector<1x8x128xf32> to vector<8x128xf32>
    %18 = vector.shape_cast %15 : vector<8x128xf32> to vector<1x8x128xf32>
    tpu.vector_store %arg6[%c0_15, %c0_16, %c0_17], %18 {strides = array<i32>} : memref<1x8x128xf32, #tpu.memory_space<vmem>>, vector<1x8x128xf32>,
    return
  }
  func.func @transform_0(%arg0: i32, %arg1: i32) -> (i32, i32, i32) {
    %c0_i32 = arith.constant 0 : i32
    %c0_i32_0 = arith.constant 0 : i32
    return %arg0, %arg1, %c0_i32 : i32, i32, i32
  }
  func.func @transform_1(%arg0: i32, %arg1: i32) -> (i32, i32, i32, i32) {
    %c0_i32 = arith.constant 0 : i32
    %c0_i32_0 = arith.constant 0 : i32
    %c0_i32_1 = arith.constant 0 : i32
    return %arg0, %arg1, %c0_i32, %c0_i32_0 : i32, i32, i32, i32
  }
  func.func @transform_2(%arg0: i32, %arg1: i32) -> (i32, i32) {
    %c0_i32 = arith.constant 0 : i32
    %c0_i32_0 = arith.constant 0 : i32
    %c0_i32_1 = arith.constant 0 : i32
    return %c0_i32, %c0_i32_0 : i32, i32
  }
  func.func @transform_3(%arg0: i32, %arg1: i32) -> (i32, i32) {
    %c0_i32 = arith.constant 0 : i32
    %c0_i32_0 = arith.constant 0 : i32
    %c0_i32_1 = arith.constant 0 : i32
    return %c0_i32, %c0_i32_0 : i32, i32
  }
  func.func @transform_4(%arg0: i32, %arg1: i32) -> (i32, i32, i32) {
    %c0_i32 = arith.constant 0 : i32
    %c0_i32_0 = arith.constant 0 : i32
    return %arg0, %arg1, %c0_i32 : i32, i32, i32
  }
}

module attributes {stable_mosaic.version = 11 : i64} {
  func.func @_dwconv_fused_kernel(%arg0: i32, %arg1: i32, %arg2: memref<1x8x128xf32, #tpu.memory_space<vmem>>, %arg3: memref<1x1x8x128xf32, #tpu.memory_space<vmem>>, %arg4: memref<384x128xf32, #tpu.memory_space<vmem>>, %arg5: memref<1x128xf32, #tpu.memory_space<vmem>>, %arg6: memref<1x8x128xf32, #tpu.memory_space<vmem>>, %arg7: memref<16x128xf32, #tpu.memory_space<vmem>>) attributes {dimension_semantics = [#tpu.dimension_semantics<parallel>, #tpu.dimension_semantics<parallel>], iteration_bounds = array<i64: 2, 1>, scalar_prefetch = 0 : i64, scratch_operands = 1 : i64, tpu.core_type = #tpu.core_type<tc>, window_params = [{transform_indices = @transform_0, window_bounds = array<i64: 1, 8, 128>}, {transform_indices = @transform_1, window_bounds = array<i64: 1, 1, 8, 128>}, {pipeline_mode = #tpu.pipeline_mode<synchronous>, transform_indices = @transform_2, window_bounds = array<i64: 384, 128>}, {pipeline_mode = #tpu.pipeline_mode<synchronous>, transform_indices = @transform_3, window_bounds = array<i64: 1, 128>}, {transform_indices = @transform_4, window_bounds = array<i64: 1, 8, 128>}]} {
    %c0 = arith.constant 0 : index
    %c0_0 = arith.constant 0 : index
    %c0_1 = arith.constant 0 : index
    %0 = vector.load %arg2[%c0, %c0_0, %c0_1] : memref<1x8x128xf32, #tpu.memory_space<vmem>>, vector<1x8x128xf32>
    %1 = vector.shape_cast %0 : vector<1x8x128xf32> to vector<8x128xf32>
    %c0_2 = arith.constant 0 : index
    %c0_3 = arith.constant 0 : index
    %c0_4 = arith.constant 0 : index
    %c0_5 = arith.constant 0 : index
    %2 = vector.load %arg3[%c0_2, %c0_3, %c0_4, %c0_5] : memref<1x1x8x128xf32, #tpu.memory_space<vmem>>, vector<1x1x8x128xf32>
    %3 = vector.shape_cast %2 : vector<1x1x8x128xf32> to vector<8x128xf32>
    %c0_6 = arith.constant 0 : index
    %c0_7 = arith.constant 0 : index
    %4 = vector.load %arg7[%c0_6, %c0_7] : memref<16x128xf32, #tpu.memory_space<vmem>>, vector<8x128xf32>
    tpu.vector_store %arg7[%c0_6, %c0_7], %3 {strides = array<i32>} : memref<16x128xf32, #tpu.memory_space<vmem>>, vector<8x128xf32>,
    %c8 = arith.constant 8 : index
    %c0_8 = arith.constant 0 : index
    %5 = vector.load %arg7[%c8, %c0_8] : memref<16x128xf32, #tpu.memory_space<vmem>>, vector<8x128xf32>
    tpu.vector_store %arg7[%c8, %c0_8], %1 {strides = array<i32>} : memref<16x128xf32, #tpu.memory_space<vmem>>, vector<8x128xf32>,
    %c6 = arith.constant 6 : index
    %c0_9 = arith.constant 0 : index
    %6 = vector.load %arg7[%c6, %c0_9] : memref<16x128xf32, #tpu.memory_space<vmem>>, vector<8x128xf32>
    %c7 = arith.constant 7 : index
    %c0_10 = arith.constant 0 : index
    %7 = vector.load %arg7[%c7, %c0_10] : memref<16x128xf32, #tpu.memory_space<vmem>>, vector<8x128xf32>
    %8 = tpu.concatenate %6, %7, %1 in 1 : vector<8x128xf32>, vector<8x128xf32>, vector<8x128xf32> -> vector<8x384xf32>
    %c0_11 = arith.constant 0 : index
    %c0_12 = arith.constant 0 : index
    %9 = vector.load %arg4[%c0_11, %c0_12] : memref<384x128xf32, #tpu.memory_space<vmem>>, vector<384x128xf32>
    %cst = arith.constant dense<0.000000e+00> : vector<8x128xf32>
    %10 = tpu.matmul %8, %9, %cst {dimension_numbers = #tpu.dot_dimension_numbers<[1], [0], [0], [1], [0, 0, 1, 1], [], []>} : vector<8x384xf32>, vector<384x128xf32>, vector<8x128xf32> -> vector<8x128xf32>
    %c0_13 = arith.constant 0 : index
    %c0_14 = arith.constant 0 : index
    %11 = vector.load %arg5[%c0_13, %c0_14] : memref<1x128xf32, #tpu.memory_space<vmem>>, vector<1x128xf32>
    %12 = vector.shape_cast %11 : vector<1x128xf32> to vector<128xf32>
    %13 = vector.shape_cast %12 : vector<128xf32> to vector<1x128xf32>
    %14 = vector.broadcast %13 : vector<1x128xf32> to vector<8x128xf32>
    %15 = arith.addf %10, %14 : vector<8x128xf32>
    %c0_15 = arith.constant 0 : index
    %c0_16 = arith.constant 0 : index
    %c0_17 = arith.constant 0 : index
    %16 = vector.load %arg6[%c0_15, %c0_16, %c0_17] : memref<1x8x128xf32, #tpu.memory_space<vmem>>, vector<1x8x128xf32>
    %17 = vector.shape_cast %16 : vector<1x8x128xf32> to vector<8x128xf32>
    %18 = vector.shape_cast %15 : vector<8x128xf32> to vector<1x8x128xf32>
    tpu.vector_store %arg6[%c0_15, %c0_16, %c0_17], %18 {strides = array<i32>} : memref<1x8x128xf32, #tpu.memory_space<vmem>>, vector<1x8x128xf32>,
    return
  }
  func.func @transform_0(%arg0: i32, %arg1: i32) -> (i32, i32, i32) {
    %c0_i32 = arith.constant 0 : i32
    %c0_i32_0 = arith.constant 0 : i32
    return %arg0, %arg1, %c0_i32 : i32, i32, i32
  }
  func.func @transform_1(%arg0: i32, %arg1: i32) -> (i32, i32, i32, i32) {
    %c0_i32 = arith.constant 0 : i32
    %c0_i32_0 = arith.constant 0 : i32
    %c0_i32_1 = arith.constant 0 : i32
    return %arg0, %arg1, %c0_i32, %c0_i32_0 : i32, i32, i32, i32
  }
  func.func @transform_2(%arg0: i32, %arg1: i32) -> (i32, i32) {
    %c0_i32 = arith.constant 0 : i32
    %c0_i32_0 = arith.constant 0 : i32
    %c0_i32_1 = arith.constant 0 : i32
    return %c0_i32, %c0_i32_0 : i32, i32
  }
  func.func @transform_3(%arg0: i32, %arg1: i32) -> (i32, i32) {
    %c0_i32 = arith.constant 0 : i32
    %c0_i32_0 = arith.constant 0 : i32
    %c0_i32_1 = arith.constant 0 : i32
    return %c0_i32, %c0_i32_0 : i32, i32
  }
  func.func @transform_4(%arg0: i32, %arg1: i32) -> (i32, i32, i32) {
    %c0_i32 = arith.constant 0 : i32
    %c0_i32_0 = arith.constant 0 : i32
    return %arg0, %arg1, %c0_i32 : i32, i32, i32
  }
}

</mosaic_0001>

<bundles_post_ra>
// kernel: tpu_custom_call.1
= control target key start
LH: loop header
LB: loop body
LE: loop exit
PB: predicated region body
PF: predicated region fallthrough
CT: control target
= control target key end

     0   :  { %s1339_s0 = inlined_call_operand.hbm [shape: f32[2,8,128], index: 0, kind: input, shape index: {}]   ;;  %s1340_s1 = inlined_call_operand.hbm [shape: f32[2,1,8,128], index: 1, kind: input, shape index: {}]   ;;  %s1341_s2 = inlined_call_operand.hbm [shape: f32[384,128], index: 2, kind: input, shape index: {}]   ;;  %s1342_s3 = inlined_call_operand.vmem [shape: f32[1,128], index: 3, kind: input, shape index: {}]   ;;  %s1343_s4 = inlined_call_operand.hbm [shape: f32[2,8,128], index: 4, kind: output, shape index: {}]  }
   0x1   :  { %1350 = sst [smem:[#allocation16_spill]] %s1341_s2 }
   0x2   :  { %9 = vsyncpa [#allocation4], 0 }
   0x3   :  { %11 = vsyncpa [#allocation4 + $0x1], 0 }
   0x4   :  { %12 = vsyncpa [#allocation7], 0 }
   0x5   :  { %14 = vsyncpa [#allocation7 + $0x1], 0 }
   0x6   :  { %15 = vsyncpa [#allocation5], 0 }
   0x7   :  { %17 = vsyncpa [#allocation5 + $0x1], 0  ;;  %s1073_s15 = smov 0   ;;  %s1075_s16 = smov 0  }
   0x8   :  { %s1077_s17 = smov 0   ;;  %s1079_s18 = smov 0  }
   0x9   :  { %s1081_s19 = smov 0   ;;  %s1083_s20 = smov 0  }
   0xa LB: > { %1351 = sst [smem:[#allocation14_spill]] %s1033_s19  ;;  %s1104_s21 = sadd.s32 4294967295, %s1037_s20   ;;  %s1037_s20 = sphi %s1083_s20, %s23_s20   ;;  %s1033_s19 = sphi %s1081_s19, %s1370_s19   ;;  %s1029_s18 = sphi %s1079_s18, %s1369_s18   ;;  %s1025_s17 = sphi %s1077_s17, %s1373_s17   ;;  %s1021_s16 = sphi %s1075_s16, %s1372_s16   ;;  %s1017_s15 = sphi %s1073_s15, %s1371_s15  }
   0xb   : > { %s615_s22 = sadd.s32 4294967294, %s1037_s20   ;;  %p57_p0 = scmp.ne.s32.totalorder %s1021_s16, %s1017_s15 }
   0xc   : > { %p1344_p1 = scmp.eq.s32.totalorder %s1104_s21, 0  ;;  %p159_p3 = scmp.eq.s32.totalorder %s615_s22, 1 }
   0xd   : > { %p616_p5 = scmp.ge.s32.totalorder %s1037_s20, 1  ;;  %p166_p7 = scmp.lt.s32.totalorder %s1037_s20, 3 }
   0xe   : > { %p1113_p4 = por %p1344_p1, %p57_p0  ;;  %p1118_p6 = por %p159_p3, %p57_p0 }
   0xf   : > { %p1123_p8 = pnand %p616_p5, %p166_p7  ;;  %s1039_s26 = smov [#allocation8]  }
  0x10   : > { %s1352_s23 = scalar_select %p1113_p4, 1, 0 }
  0x11   : > { %s1353_s24 = scalar_select %p1118_p6, 1, 0 }
  0x12   : > { %s1354_s25 = scalar_select %p1123_p8, 1, 0 }
  0x13   : > { %s178_s27 = sshll.u32 %s1039_s26, 4  ;;  %p786_p9 = pneg %p1123_p8  ;;  %s179_s27 = int_to_ptr.vmem [resolvable:$true] %s178_s27 }
  0x14   : > { %s35_s29 = sadd.s32 1, %s1033_s19  ;;  %s1356_s2 = sld [smem:[#allocation16_spill]] }
  0x15   : > { %p1132_p11 = pnand %p786_p9, %p1344_p1 }
  0x17   : > { %p861_p13 = pneg %p1132_p11 }
  0x1a   : > { %s859_s6 = scalar_lea.hbm %s1356_s2, 6144 }
  0x1b   : > { %p860_p12 = scmp.ne.s32.totalorder %s1356_s2, %s859_s6  ;;  %p866_p5 = scmp.lt.u32.totalorder %s859_s6, %s1356_s2 }
  0x1d   : > { %p862_p0 = pnand %p861_p13, %p860_p12 }
  0x1f   : > { %p863_p3 = pneg %p862_p0 }
  0x21   : > { %p868_p7 = pnand %p866_p5, %p863_p3 }
  0x23   : > { %871 = shalt.err (!%p868_p7)
}
  0x24   : > { %s872_s11 = scalar_lea.vmem %s179_s27, 6144  ;;  %p880_p2 = scmp.lt.s32.totalorder %s179_s27, %s179_s27 }
  0x25   : > { %p873_p9 = scmp.ne.s32.totalorder %s179_s27, %s872_s11  ;;  %p881_p6 = scmp.lt.s32.totalorder %s872_s11, %s872_s11 }
  0x27   : > { %p875_p10 = pnand %p873_p9, %p861_p13  ;;  %p882_p4 = por %p881_p6, %p880_p2 }
  0x29   : > { %p876_p1 = pneg %p875_p10 }
  0x2b   : > { %p883_p8 = pnand %p882_p4, %p876_p1 }
  0x2d   : > { %886 = shalt.err (!%p883_p8)
}
  0x2e   : > { %s1040_s12 = smov 128   ;;  %s1041_s13 = smov 8  }
  0x2f   : > { %789 = dma.hbm_to_vmem [thread:$0]  (!%p1132_p11), %s1356_s2, 6144, %s179_s27, [#allocation7], %s1040_s12, %s1040_s12, %s1041_s13  }
  0x30   : > { %p37_p1 = scmp.ge.s32.totalorder %s35_s29, 2  ;;  %s44_s26 = sadd.s32 1, %s1025_s17 }
  0x31   : > { %p51_p2 = scmp.ne.s32.totalorder %s1025_s17, %s1021_s16  ;;  %p52_p4 = scmp.eq.s32.totalorder %s1037_s20, 0 }
  0x32   : > { %s1375_s29 = smov (%p37_p1, %s35_s29), 0  ;;  %p1359_p8 = scmp.eq.s32.totalorder %s1104_s21, 1 }
  0x33   : > { %1357 = sst [smem:[#allocation15_spill]] %s1375_s29  ;;  %p1159_p6 = por %p52_p4, %p51_p2 }
  0x34   : > { %p1165_p10 = por %p1359_p8, %p51_p2  ;;  %s39_s5 = ssub.s32 %s1033_s19, %s1375_s29 }
  0x35   : > { %p802_p11 = scmp.lt.s32.totalorder %s1037_s20, 2  ;;  %p42_p12 = scmp.eq.s32.totalorder %s39_s5, 0 }
  0x36   : > { %s1360_s28 = scalar_select %p1165_p10, 1, 0 }
  0x37   : > { %s195_s27 = sand.u32 1, %s1025_s17   ;;  %s620_s8 = sshll.u32 %s1033_s19, 7 }
  0x38   : > { %s1173_s6 = sshll.u32 %s195_s27, 3  ;;  %s1182_s11 = scalar_lea.hbm %s1339_s0, %s620_s8 }
  0x39   : > { %s1176_s7 = scalar_select %p42_p12, %s1025_s17, %s44_s26  }
  0x3a   : > { %s199_s12 = scalar_lea.vmem [#allocation3], %s1173_s6  ;;  %p1189_p13 = pnand %p802_p11, %p1159_p6 }
  0x3b   : > { %s207_s13 = sshll.u32 %s199_s12, 4  ;;  %s1196_s5 = scalar_lea.hbm %s1340_s1, %s620_s8  ;;  %s1185_s13 = int_to_ptr.vmem [resolvable:$true] %s207_s13 }
  0x3c   : > { %s214_s9 = sand.u32 1, %s1037_s20   ;;  %s196_s10 = scalar_lea.sflag [#allocation4], %s195_s27 }
  0x3d   : > { %s887_s2 = scalar_lea.hbm %s1182_s11, 128  ;;  %p889_p3 = pneg %p1189_p13 }
  0x3e   : > { %p888_p0 = scmp.ne.s32.totalorder %s1182_s11, %s887_s2  ;;  %s892_s29 = scalar_lea.hbm %s1339_s0, 256 }
  0x3f   : > { %p893_p9 = scmp.lt.u32.totalorder %s1182_s11, %s1339_s0  ;;  %p894_p1 = scmp.lt.u32.totalorder %s892_s29, %s887_s2 }
  0x40   : > { %p890_p5 = pnand %p889_p3, %p888_p0  ;;  %p896_p4 = scmp.lt.u32.totalorder %s887_s2, %s1182_s11 }
  0x41   : > { %p895_p2 = por %p894_p1, %p893_p9 }
  0x42   : > { %p891_p7 = pneg %p890_p5 }
  0x43   : > { %p897_p6 = por %p896_p4, %p895_p2 }
  0x45   : > { %p898_p8 = pnand %p897_p6, %p891_p7 }
  0x47   : > { %901 = shalt.err (!%p898_p8)
}
  0x48   : > { %s902_s27 = scalar_lea.vmem %s1185_s13, 128  ;;  %s1042_s8 = smov [#allocation3]  }
  0x49   : > { %p903_p11 = scmp.ne.s32.totalorder %s1185_s13, %s902_s27  ;;  %s907_s26 = sshll.u32 %s1042_s8, 4  ;;  %s908_s26 = int_to_ptr.vmem [resolvable:$false] %s907_s26 }
  0x4a   : > { %s909_s19 = scalar_lea.vmem %s908_s26, 256  ;;  %p910_p5 = scmp.lt.s32.totalorder %s1185_s13, %s908_s26 }
  0x4b   : > { %p905_p12 = pnand %p903_p11, %p889_p3  ;;  %p911_p9 = scmp.lt.s32.totalorder %s909_s19, %s902_s27 }
  0x4d   : > { %p906_p0 = pneg %p905_p12  ;;  %p912_p1 = por %p911_p9, %p910_p5 }
  0x4f   : > { %p913_p2 = pnand %p912_p1, %p906_p0 }
  0x51   : > { %916 = shalt.err (!%p913_p2)
}
  0x52   : > { %793 = dma.hbm_to_vmem [thread:$0]  (!%p1189_p13), %s1182_s11, 128, %s1185_s13, %s196_s10  }
  0x53   : > { %s218_s2 = scalar_lea.vmem [#allocation6], %s1173_s6  ;;  %s215_s30 = scalar_lea.sflag [#allocation7], %s214_s9 }
  0x54   : > { %s226_s29 = sshll.u32 %s218_s2, 4  ;;  %s917_s12 = scalar_lea.hbm %s1196_s5, 128  ;;  %s227_s29 = int_to_ptr.vmem [resolvable:$true] %s226_s29 }
  0x55   : > { %p918_p7 = scmp.ne.s32.totalorder %s1196_s5, %s917_s12  ;;  %s922_s8 = scalar_lea.hbm %s1340_s1, 256 }
  0x56   : > { %p923_p8 = scmp.lt.u32.totalorder %s1196_s5, %s1340_s1  ;;  %p924_p11 = scmp.lt.u32.totalorder %s922_s8, %s917_s12 }
  0x57   : > { %p920_p4 = pnand %p918_p7, %p889_p3  ;;  %p926_p0 = scmp.lt.u32.totalorder %s917_s12, %s1196_s5 }
  0x58   : > { %p925_p12 = por %p924_p11, %p923_p8 }
  0x59   : > { %p921_p6 = pneg %p920_p4 }
  0x5a   : > { %p927_p5 = por %p926_p0, %p925_p12 }
  0x5c   : > { %p928_p9 = pnand %p927_p5, %p921_p6 }
  0x5e   : > { %931 = shalt.err (!%p928_p9)
}
  0x5f   : > { %s932_s6 = scalar_lea.vmem %s227_s29, 128  ;;  %s1043_s11 = smov [#allocation6]  }
  0x60   : > { %p933_p1 = scmp.ne.s32.totalorder %s227_s29, %s932_s6  ;;  %s937_s13 = sshll.u32 %s1043_s11, 4  ;;  %s938_s13 = int_to_ptr.vmem [resolvable:$false] %s937_s13 }
  0x61   : > { %s939_s9 = scalar_lea.vmem %s938_s13, 256  ;;  %p940_p4 = scmp.lt.s32.totalorder %s227_s29, %s938_s13 }
  0x62   : > { %p935_p2 = pnand %p933_p1, %p889_p3  ;;  %p941_p10 = scmp.lt.s32.totalorder %s939_s9, %s932_s6 }
  0x64   : > { %p936_p7 = pneg %p935_p2  ;;  %p942_p8 = por %p941_p10, %p940_p4 }
  0x66   : > { %p943_p11 = pnand %p942_p8, %p936_p7 }
  0x68   : > { %946 = shalt.err (!%p943_p11)
}
  0x69   : > { %796 = dma.hbm_to_vmem [thread:$0]  (!%p1189_p13), %s1196_s5, 128, %s227_s29, %s215_s30  }
  0x6a   : > { %p1362_p6 = scmp.ne.s32.totalorder %s1354_s25, 0 }
  0x6b   : > { %s1249_s10 = sand.u32 (!%p1362_p6), 1, %s1021_s16   ;;  %p1363_p10 = scmp.ne.s32.totalorder (!%p1362_p6), %s1352_s23, 0 }
  0x6c   : > { %235 = sbr.rel (%p1362_p6) target bundleno = 390 (0x186), region = 36  ;;  %s1252_s2 = sshll.u32 (!%p1362_p6), %s1249_s10, 3 }
  0x6d   : > { %s238_s12 = scalar_lea.sflag (!%p1362_p6), [#allocation4], %s1249_s10  ;;  %s241_s22 = scalar_lea.vmem (!%p1362_p6), [#allocation3], %s1252_s2 }
  0x73   : > { %1000 = dma.done.wait (%p1363_p10), %s238_s12, 128  }
  0x74   : > { %1002 = vsyncadd (%p1363_p10), %s238_s12, 4294967168  ;;  %s246_s25 = sand.u32 1, %s1104_s21   ;;  %s250_s5 = scalar_lea.vmem [#allocation6], %s1252_s2 }
  0x75   : > { %s247_s14 = scalar_lea.sflag [#allocation7], %s246_s25 }
  0x76   : > { %1004 = dma.done.wait (%p1363_p10), %s247_s14, 128  }
  0x77   : > { %1006 = vsyncadd (%p1363_p10), %s247_s14, 4294967168  ;;  %p1364_p13 = scmp.eq.s32.totalorder %s1104_s21, 0 }
  0x79   : > { %1008 = dma.done.wait (%p1364_p13), [#allocation7], 6144   ;;  %p1365_p3 = pmov %p1364_p13 }
  0x7a   : > { %v1044_v0 = vmov 0.0|0.0   ;;  %vm1045_vm0 = vmmov 0   ;;  %v1046_v1 = vmov 0.0   ;;  %v306_v2 = vld [vmem:[#allocation8 + $0x80] sm:$0xff]  ;;  %v307_v3 = vld [vmem:[#allocation8 + $0x88] sm:$0xff]  ;;  %v308_v7 = vld [vmem:[#allocation8 + $0x90] sm:$0xff] }
  0x7b   : > { %1010 = vsyncadd (%p1365_p3), [#allocation7], 4294961152  ;;  %752 = vmatprep.subr.bf16.mxu1 %v1044_v0  ;;  %717 = vmatprep.mubr.msk.f32.mxu1 %vm1045_vm0, %v1046_v1  ;;  %v290_v4 = vld [vmem:[#allocation8] sm:$0xff]  ;;  %v720_v5 = vpack.c.bf16 %v307_v3, %v306_v2  ;;  %v291_v6 = vld [vmem:[#allocation8 + $0x8] sm:$0xff]  ;;  %s630_s29 = sshll.u32 %s1029_s18, 7  ;;  %s283_s30 = scalar_lea.vmem [#allocation9], %s1252_s2 }
  0x7c   : > { %v309_v8 = vld [vmem:[#allocation8 + $0x98] sm:$0xff]  ;;  %v722_v9 = vpack.c.bf16 %v291_v6, %v290_v4  ;;  %v292_v11 = vld [vmem:[#allocation8 + $0x10] sm:$0xff]  ;;  %v322_v13 = vld [vmem:[#allocation8 + $0x100] sm:$0xff]  ;;  %s501_s27 = sshll.u32 %s283_s30, 4  ;;  %s1290_s19 = scalar_lea.hbm %s1343_s4, %s630_s29  ;;  %s1292_s27 = int_to_ptr.vmem [resolvable:$true] %s501_s27 }
  0x7d   : > { %v724_v10 = vpack.c.bf16 %v309_v8, %v308_v7  ;;  %v293_v12 = vld [vmem:[#allocation8 + $0x18] sm:$0xff]  ;;  %721 = vmatprep.subr.bf16.mxu0 %v720_v5  ;;  %v323_v14 = vld [vmem:[#allocation8 + $0x108] sm:$0xff]  ;;  %v310_v15 = vld [vmem:[#allocation8 + $0xa0] sm:$0xff]  ;;  %s487_s6 = scalar_lea.sflag [#allocation5], %s1249_s10  ;;  %s947_s11 = scalar_lea.vmem %s1292_s27, 128 }
  0x7e   : > { %v311_v16 = vld [vmem:[#allocation8 + $0xa8] sm:$0xff]  ;;  %723 = vmatpush3.bf16.msra.mxu0 %v722_v9  ;;  %v726_v17 = vpack.c.bf16 %v293_v12, %v292_v11  ;;  %v753_v18 = vpack.c.bf16 %v323_v14, %v322_v13  ;;  %v324_v19 = vld [vmem:[#allocation8 + $0x110] sm:$0xff]  ;;  %v294_v21 = vld [vmem:[#allocation8 + $0x20] sm:$0xff]  ;;  %p948_p12 = scmp.ne.s32.totalorder %s1292_s27, %s947_s11  ;;  %p1366_p0 = scmp.ne.s32.totalorder %s1360_s28, 0 }
  0x7f   : > { %725 = vmatprep.subr.bf16.mxu0 %v724_v10  ;;  %v728_v20 = vpack.c.bf16 %v311_v16, %v310_v15  ;;  %v295_v22 = vld [vmem:[#allocation8 + $0x28] sm:$0xff]  ;;  %v325_v23 = vld [vmem:[#allocation8 + $0x118] sm:$0xff]  ;;  %v312_v25 = vld [vmem:[#allocation8 + $0xb0] sm:$0xff]  ;;  %s1047_s18 = smov [#allocation9]  }
  0x80   : > { %754 = vmatpush3.bf16.msra.mxu1 %v753_v18  ;;  %v756_v24 = vpack.c.bf16 %v325_v23, %v324_v19  ;;  %v313_v26 = vld [vmem:[#allocation8 + $0xb8] sm:$0xff]  ;;  %v326_v27 = vld [vmem:[#allocation8 + $0x120] sm:$0xff]  ;;  %v327_v28 = vld [vmem:[#allocation8 + $0x128] sm:$0xff]  ;;  %v730_v29 = vpack.c.bf16 %v295_v22, %v294_v21  ;;  %p949_p5 = pnand %p948_p12, %p1366_p0  ;;  %s951_s13 = sshll.u32 %s1047_s18, 4  ;;  %s952_s13 = int_to_ptr.vmem [resolvable:$false] %s951_s13 }
  0x81   : > { %755 = vmatprep.subr.bf16.mxu1 %v1044_v0  ;;  %v732_v30 = vpack.c.bf16 %v313_v26, %v312_v25  ;;  %v296_v31 = vld [vmem:[#allocation8 + $0x30] sm:$0xff]  ;;  %v297_v32 = vld [vmem:[#allocation8 + $0x38] sm:$0xff]  ;;  %v759_v33 = vpack.c.bf16 %v327_v28, %v326_v27  ;;  %v314_v34 = vld [vmem:[#allocation8 + $0xc0] sm:$0xff]  ;;  %s953_s9 = scalar_lea.vmem %s952_s13, 256  ;;  %p954_p1 = scmp.lt.s32.totalorder %s1292_s27, %s952_s13 }
  0x82   : > { %727 = vmatpush3.bf16.msra.mxu0 %v726_v17  ;;  %v315_v35 = vld [vmem:[#allocation8 + $0xc8] sm:$0xff]  ;;  %v328_v36 = vld [vmem:[#allocation8 + $0x130] sm:$0xff]  ;;  %v329_v37 = vld [vmem:[#allocation8 + $0x138] sm:$0xff]  ;;  %v734_v38 = vpack.c.bf16 %v297_v32, %v296_v31  ;;  %p950_p9 = pneg %p949_p5  ;;  %p955_p2 = scmp.lt.s32.totalorder %s953_s9, %s947_s11 }
  0x83   : > { %729 = vmatprep.subr.bf16.mxu0 %v728_v20  ;;  %v736_v39 = vpack.c.bf16 %v315_v35, %v314_v34  ;;  %v298_v40 = vld [vmem:[#allocation8 + $0x40] sm:$0xff]  ;;  %v299_v41 = vld [vmem:[#allocation8 + $0x48] sm:$0xff]  ;;  %v762_v42 = vpack.c.bf16 %v329_v37, %v328_v36  ;;  %v316_v43 = vld [vmem:[#allocation8 + $0xd0] sm:$0xff] }
  0x84   : > { %757 = vmatpush3.bf16.msra.mxu1 %v756_v24  ;;  %v317_v44 = vld [vmem:[#allocation8 + $0xd8] sm:$0xff]  ;;  %v330_v45 = vld [vmem:[#allocation8 + $0x140] sm:$0xff]  ;;  %v331_v46 = vld [vmem:[#allocation8 + $0x148] sm:$0xff]  ;;  %v738_v49 = vpack.c.bf16 %v299_v41, %v298_v40  ;;  %p956_p7 = por %p955_p2, %p954_p1 }
  0x85   : > { %758 = vmatprep.subr.bf16.mxu1 %v1044_v0  ;;  %v284_v47 = vld [vmem:[%s241_s22] sm:$0xff]  ;;  %v285_v48 = vld [vmem:[%s250_s5] sm:$0xff]  ;;  %v740_v50 = vpack.c.bf16 %v317_v44, %v316_v43  ;;  %v765_v53 = vpack.c.bf16 %v331_v46, %v330_v45 }
  0x86   : > { %731 = vmatpush3.bf16.msra.mxu0 %v730_v29  ;;  %286 = vst [vmem:[#allocation2] sm:$0xff] %v285_v48  ;;  %287 = vst [vmem:[#allocation2 + $0x8] sm:$0xff] %v284_v47  ;;  %v300_v51 = vld [vmem:[#allocation8 + $0x50] sm:$0xff]  ;;  %v301_v52 = vld [vmem:[#allocation8 + $0x58] sm:$0xff]  ;;  %p957_p4 = pnand %p956_p7, %p950_p9 }
  0x87   : > { %733 = vmatprep.subr.bf16.mxu0 %v732_v30  ;;  %v318_v54 = vld [vmem:[#allocation8 + $0xe0] sm:$0xff]  ;;  %v319_v55 = vld [vmem:[#allocation8 + $0xe8] sm:$0xff]  ;;  %v332_v56 = vld [vmem:[#allocation8 + $0x150] sm:$0xff]  ;;  %v742_v58 = vpack.c.bf16 %v301_v52, %v300_v51 }
  0x88   : > { %760 = vmatpush3.bf16.msra.mxu1 %v759_v33  ;;  %v333_v57 = vld [vmem:[#allocation8 + $0x158] sm:$0xff]  ;;  %v744_v59 = vpack.c.bf16 %v319_v55, %v318_v54  ;;  %v302_v60 = vld [vmem:[#allocation8 + $0x60] sm:$0xff]  ;;  %v303_v61 = vld [vmem:[#allocation8 + $0x68] sm:$0xff] }
  0x89   : > { %761 = vmatprep.subr.bf16.mxu1 %v1044_v0  ;;  %v768_v62 = vpack.c.bf16 %v333_v57, %v332_v56  ;;  %v320_v63 = vld [vmem:[#allocation8 + $0xf0] sm:$0xff]  ;;  %v321_v1 = vld [vmem:[#allocation8 + $0xf8] sm:$0xff]  ;;  %v334_v2 = vld [vmem:[#allocation8 + $0x160] sm:$0xff]  ;;  %v746_v5 = vpack.c.bf16 %v303_v61, %v302_v60 }
  0x8a   : > { %735 = vmatpush3.bf16.msra.mxu0 %v734_v38  ;;  %v335_v3 = vld [vmem:[#allocation8 + $0x168] sm:$0xff]  ;;  %v748_v6 = vpack.c.bf16 %v321_v1, %v320_v63  ;;  %v304_v7 = vld [vmem:[#allocation8 + $0x70] sm:$0xff]  ;;  %v305_v8 = vld [vmem:[#allocation8 + $0x78] sm:$0xff] }
  0x8b   : > { %737 = vmatprep.subr.bf16.mxu0 %v736_v39  ;;  %v771_v9 = vpack.c.bf16 %v335_v3, %v334_v2  ;;  %v336_v10 = vld [vmem:[#allocation8 + $0x170] sm:$0xff]  ;;  %v337_v11 = vld [vmem:[#allocation8 + $0x178] sm:$0xff]  ;;  %v750_v12 = vpack.c.bf16 %v305_v8, %v304_v7 }
  0x8c   : > { %763 = vmatpush3.bf16.msra.mxu1 %v762_v42  ;;  %v774_v13 = vpack.c.bf16 %v337_v11, %v336_v10  ;;  %v628_v17 = vld [vmem:[%s1342_s3] ss:$0 sm:$0xff] }
  0x8d   : > { %764 = vmatprep.subr.bf16.mxu1 %v1044_v0  ;;  %v289_v4 = vld [vmem:[#allocation2 + $0x7] sm:$0xff] }
  0x8e   : > { %739 = vmatpush3.bf16.msra.mxu0 %v738_v49  ;;  %409 = vmatprep.mubr.f32.mxu0 %v289_v4  ;;  %v288_v14 = vld [vmem:[#allocation2 + $0x6] sm:$0xff] }
  0x8f   : > { %741 = vmatprep.subr.bf16.mxu0 %v740_v50 }
  0x90   : > { %766 = vmatpush3.bf16.msra.mxu1 %v765_v53 }
  0x91   : > { %767 = vmatprep.subr.bf16.mxu1 %v1044_v0 }
  0x92   : > { %743 = vmatpush3.bf16.msra.mxu0 %v742_v58 }
  0x93   : > { %745 = vmatprep.subr.bf16.mxu0 %v744_v59 }
  0x94   : > { %769 = vmatpush3.bf16.msra.mxu1 %v768_v62 }
  0x95   : > { %770 = vmatprep.subr.bf16.mxu1 %v1044_v0 }
  0x96   : > { %747 = vmatpush3.bf16.msra.mxu0 %v746_v5 }
  0x97   : > { %749 = vmatprep.subr.bf16.mxu0 %v748_v6 }
  0x98   : > { %772 = vmatpush3.bf16.msra.mxu1 %v771_v9 }
  0x99   : > { %773 = vmatprep.subr.bf16.mxu1 %v1044_v0 }
  0x9a   : > { %751 = vmatpush3.bf16.msra.mxu0 %v750_v12 }
  0x9c   : > { %775 = vmatpush3.bf16.msra.mxu1 %v774_v13 }
  0x9d   : > { %410 = vmatmul.mubr.f32.vlgmr.msra.gmra.mrb[0].mxu0 %v288_v14 }
  0x9f   : > { %718 = vmatmul.mubr.f32.vlgmr.msra.gmra.mrb[0].mxu1 %v284_v47 }
 0x170   : > { %v665_v15 = vpop.f32.mrb[0].mxu0 }
 0x171   : > { %v666_v16 = vpop.f32.mrb[1].mxu0 }
 0x172   : > { %v667_v18 = vadd.f32 %v666_v16, %v665_v15  ;;  %v481_v19 = vpop.f32.mrb[0].mxu1 }
 0x173   : > { %v719_v20 = vpop.f32.mrb[1].mxu1 }
 0x174   : > { %v412_v0 = vadd.f32 %v667_v18, %v628_v17 }
 0x176   : > { %v482_v21 = vadd.f32 %v481_v19, %v412_v0 }
 0x178   : > { %485 = vst [vmem:[%s283_s30] sm:$0xff] %v482_v21 }
 0x179   : > { %960 = shalt.err (!%p957_p4)
}
 0x17a   : > { %s961_s10 = scalar_lea.hbm %s1290_s19, 128  ;;  %s965_s22 = scalar_lea.hbm %s1343_s4, 256 }
 0x17b   : > { %p962_p8 = scmp.ne.s32.totalorder %s1290_s19, %s961_s10  ;;  %p966_p10 = scmp.lt.u32.totalorder %s1290_s19, %s1343_s4 }
 0x17c   : > { %p967_p13 = scmp.lt.u32.totalorder %s965_s22, %s961_s10  ;;  %p969_p12 = scmp.lt.u32.totalorder %s961_s10, %s1290_s19 }
 0x17d   : > { %p963_p11 = pnand %p962_p8, %p1366_p0 }
 0x17e   : > { %p968_p3 = por %p967_p13, %p966_p10 }
 0x17f   : > { %p964_p6 = pneg %p963_p11 }
 0x180   : > { %p970_p5 = por %p969_p12, %p968_p3 }
 0x182   : > { %p971_p9 = pnand %p970_p5, %p964_p6 }
 0x184   : > { %974 = shalt.err (!%p971_p9)
}
 0x185   : > { %784 = dma.vmem_to_hbm [thread:$0]  (%p1366_p0), %s1292_s27, 128, %s1290_s19, %s487_s6  }
 0x186 PF: > { %s513_s5 = sand.u32 1, %s1017_s15   ;;  %p1367_p1 = scmp.ne.s32.totalorder %s1353_s24, 0 }
 0x187   : > { %p1368_p2 = scmp.ge.s32.totalorder %s1037_s20, 2  ;;  %s514_s21 = scalar_lea.sflag [#allocation5], %s513_s5 }
 0x189   : > { %p798_p7 = pnand %p1368_p2, %p1367_p1 }
 0x18b   : > { %1012 = dma.done.wait (!%p798_p7), %s514_s21, 128  }
 0x18c   : > { %1014 = vsyncadd (!%p798_p7), %s514_s21, 4294967168  ;;  %s23_s20 = sadd.s32 1, %s1037_s20   ;;  %s1369_s18 = sld [smem:[#allocation14_spill]] }
 0x18d   : > { %p20_p4 = scmp.ge.s32.totalorder %s23_s20, 4   ;;  %s1370_s19 = sld [smem:[#allocation15_spill]] }
 0x18e   : > { %s1371_s15 = smov %s1021_s16  ;;  %s1372_s16 = smov %s1025_s17 }
 0x18f   : > { %s1373_s17 = smov %s1176_s7  ;;  %22 = sbr.rel (!%p20_p4) target bundleno = 10 (0xa), region = 98 }
 0x196   :  { %519 = vsyncpa [#allocation4], 1 }
 0x197   :  { %521 = vsyncpa [#allocation4 + $0x1], 1 }
 0x198   :  { %522 = vsyncpa [#allocation7], 1 }
 0x199   :  { %524 = vsyncpa [#allocation7 + $0x1], 1 }
 0x19a   :  { %525 = vsyncpa [#allocation5], 1 }
 0x19b   :  { %527 = vsyncpa [#allocation5 + $0x1], 1 }

// kernel: tpu_custom_call.1
= control target key start
LH: loop header
LB: loop body
LE: loop exit
PB: predicated region body
PF: predicated region fallthrough
CT: control target
= control target key end

     0   :  { %s1339_s0 = inlined_call_operand.hbm [shape: f32[2,8,128], index: 0, kind: input, shape index: {}]   ;;  %s1340_s1 = inlined_call_operand.hbm [shape: f32[2,1,8,128], index: 1, kind: input, shape index: {}]   ;;  %s1341_s2 = inlined_call_operand.hbm [shape: f32[384,128], index: 2, kind: input, shape index: {}]   ;;  %s1342_s3 = inlined_call_operand.vmem [shape: f32[1,128], index: 3, kind: input, shape index: {}]   ;;  %s1343_s4 = inlined_call_operand.hbm [shape: f32[2,8,128], index: 4, kind: output, shape index: {}]  }
   0x1   :  { %1350 = sst [smem:[#allocation16_spill]] %s1341_s2 }
   0x2   :  { %9 = vsyncpa [#allocation4], 0 }
   0x3   :  { %11 = vsyncpa [#allocation4 + $0x1], 0 }
   0x4   :  { %12 = vsyncpa [#allocation7], 0 }
   0x5   :  { %14 = vsyncpa [#allocation7 + $0x1], 0 }
   0x6   :  { %15 = vsyncpa [#allocation5], 0 }
   0x7   :  { %17 = vsyncpa [#allocation5 + $0x1], 0  ;;  %s1073_s15 = smov 0   ;;  %s1075_s16 = smov 0  }
   0x8   :  { %s1077_s17 = smov 0   ;;  %s1079_s18 = smov 0  }
   0x9   :  { %s1081_s19 = smov 0   ;;  %s1083_s20 = smov 0  }
   0xa LB: > { %1351 = sst [smem:[#allocation14_spill]] %s1033_s19  ;;  %s1104_s21 = sadd.s32 4294967295, %s1037_s20   ;;  %s1037_s20 = sphi %s1083_s20, %s23_s20   ;;  %s1033_s19 = sphi %s1081_s19, %s1370_s19   ;;  %s1029_s18 = sphi %s1079_s18, %s1369_s18   ;;  %s1025_s17 = sphi %s1077_s17, %s1373_s17   ;;  %s1021_s16 = sphi %s1075_s16, %s1372_s16   ;;  %s1017_s15 = sphi %s1073_s15, %s1371_s15  }
   0xb   : > { %s615_s22 = sadd.s32 4294967294, %s1037_s20   ;;  %p57_p0 = scmp.ne.s32.totalorder %s1021_s16, %s1017_s15 }
   0xc   : > { %p1344_p1 = scmp.eq.s32.totalorder %s1104_s21, 0  ;;  %p159_p3 = scmp.eq.s32.totalorder %s615_s22, 1 }
   0xd   : > { %p616_p5 = scmp.ge.s32.totalorder %s1037_s20, 1  ;;  %p166_p7 = scmp.lt.s32.totalorder %s1037_s20, 3 }
   0xe   : > { %p1113_p4 = por %p1344_p1, %p57_p0  ;;  %p1118_p6 = por %p159_p3, %p57_p0 }
   0xf   : > { %p1123_p8 = pnand %p616_p5, %p166_p7  ;;  %s1039_s26 = smov [#allocation8]  }
  0x10   : > { %s1352_s23 = scalar_select %p1113_p4, 1, 0 }
  0x11   : > { %s1353_s24 = scalar_select %p1118_p6, 1, 0 }
  0x12   : > { %s1354_s25 = scalar_select %p1123_p8, 1, 0 }
  0x13   : > { %s178_s27 = sshll.u32 %s1039_s26, 4  ;;  %p786_p9 = pneg %p1123_p8  ;;  %s179_s27 = int_to_ptr.vmem [resolvable:$true] %s178_s27 }
  0x14   : > { %s35_s29 = sadd.s32 1, %s1033_s19  ;;  %s1356_s2 = sld [smem:[#allocation16_spill]] }
  0x15   : > { %p1132_p11 = pnand %p786_p9, %p1344_p1 }
  0x17   : > { %p861_p13 = pneg %p1132_p11 }
  0x1a   : > { %s859_s6 = scalar_lea.hbm %s1356_s2, 6144 }
  0x1b   : > { %p860_p12 = scmp.ne.s32.totalorder %s1356_s2, %s859_s6  ;;  %p866_p5 = scmp.lt.u32.totalorder %s859_s6, %s1356_s2 }
  0x1d   : > { %p862_p0 = pnand %p861_p13, %p860_p12 }
  0x1f   : > { %p863_p3 = pneg %p862_p0 }
  0x21   : > { %p868_p7 = pnand %p866_p5, %p863_p3 }
  0x23   : > { %871 = shalt.err (!%p868_p7)
}
  0x24   : > { %s872_s11 = scalar_lea.vmem %s179_s27, 6144  ;;  %p880_p2 = scmp.lt.s32.totalorder %s179_s27, %s179_s27 }
  0x25   : > { %p873_p9 = scmp.ne.s32.totalorder %s179_s27, %s872_s11  ;;  %p881_p6 = scmp.lt.s32.totalorder %s872_s11, %s872_s11 }
  0x27   : > { %p875_p10 = pnand %p873_p9, %p861_p13  ;;  %p882_p4 = por %p881_p6, %p880_p2 }
  0x29   : > { %p876_p1 = pneg %p875_p10 }
  0x2b   : > { %p883_p8 = pnand %p882_p4, %p876_p1 }
  0x2d   : > { %886 = shalt.err (!%p883_p8)
}
  0x2e   : > { %s1040_s12 = smov 128   ;;  %s1041_s13 = smov 8  }
  0x2f   : > { %789 = dma.hbm_to_vmem [thread:$0]  (!%p1132_p11), %s1356_s2, 6144, %s179_s27, [#allocation7], %s1040_s12, %s1040_s12, %s1041_s13  }
  0x30   : > { %p37_p1 = scmp.ge.s32.totalorder %s35_s29, 2  ;;  %s44_s26 = sadd.s32 1, %s1025_s17 }
  0x31   : > { %p51_p2 = scmp.ne.s32.totalorder %s1025_s17, %s1021_s16  ;;  %p52_p4 = scmp.eq.s32.totalorder %s1037_s20, 0 }
  0x32   : > { %s1375_s29 = smov (%p37_p1, %s35_s29), 0  ;;  %p1359_p8 = scmp.eq.s32.totalorder %s1104_s21, 1 }
  0x33   : > { %1357 = sst [smem:[#allocation15_spill]] %s1375_s29  ;;  %p1159_p6 = por %p52_p4, %p51_p2 }
  0x34   : > { %p1165_p10 = por %p1359_p8, %p51_p2  ;;  %s39_s5 = ssub.s32 %s1033_s19, %s1375_s29 }
  0x35   : > { %p802_p11 = scmp.lt.s32.totalorder %s1037_s20, 2  ;;  %p42_p12 = scmp.eq.s32.totalorder %s39_s5, 0 }
  0x36   : > { %s1360_s28 = scalar_select %p1165_p10, 1, 0 }
  0x37   : > { %s195_s27 = sand.u32 1, %s1025_s17   ;;  %s620_s8 = sshll.u32 %s1033_s19, 7 }
  0x38   : > { %s1173_s6 = sshll.u32 %s195_s27, 3  ;;  %s1182_s11 = scalar_lea.hbm %s1339_s0, %s620_s8 }
  0x39   : > { %s1176_s7 = scalar_select %p42_p12, %s1025_s17, %s44_s26  }
  0x3a   : > { %s199_s12 = scalar_lea.vmem [#allocation3], %s1173_s6  ;;  %p1189_p13 = pnand %p802_p11, %p1159_p6 }
  0x3b   : > { %s207_s13 = sshll.u32 %s199_s12, 4  ;;  %s1196_s5 = scalar_lea.hbm %s1340_s1, %s620_s8  ;;  %s1185_s13 = int_to_ptr.vmem [resolvable:$true] %s207_s13 }
  0x3c   : > { %s214_s9 = sand.u32 1, %s1037_s20   ;;  %s196_s10 = scalar_lea.sflag [#allocation4], %s195_s27 }
  0x3d   : > { %s887_s2 = scalar_lea.hbm %s1182_s11, 128  ;;  %p889_p3 = pneg %p1189_p13 }
  0x3e   : > { %p888_p0 = scmp.ne.s32.totalorder %s1182_s11, %s887_s2  ;;  %s892_s29 = scalar_lea.hbm %s1339_s0, 256 }
  0x3f   : > { %p893_p9 = scmp.lt.u32.totalorder %s1182_s11, %s1339_s0  ;;  %p894_p1 = scmp.lt.u32.totalorder %s892_s29, %s887_s2 }
  0x40   : > { %p890_p5 = pnand %p889_p3, %p888_p0  ;;  %p896_p4 = scmp.lt.u32.totalorder %s887_s2, %s1182_s11 }
  0x41   : > { %p895_p2 = por %p894_p1, %p893_p9 }
  0x42   : > { %p891_p7 = pneg %p890_p5 }
  0x43   : > { %p897_p6 = por %p896_p4, %p895_p2 }
  0x45   : > { %p898_p8 = pnand %p897_p6, %p891_p7 }
  0x47   : > { %901 = shalt.err (!%p898_p8)
}
  0x48   : > { %s902_s27 = scalar_lea.vmem %s1185_s13, 128  ;;  %s1042_s8 = smov [#allocation3]  }
  0x49   : > { %p903_p11 = scmp.ne.s32.totalorder %s1185_s13, %s902_s27  ;;  %s907_s26 = sshll.u32 %s1042_s8, 4  ;;  %s908_s26 = int_to_ptr.vmem [resolvable:$false] %s907_s26 }
  0x4a   : > { %s909_s19 = scalar_lea.vmem %s908_s26, 256  ;;  %p910_p5 = scmp.lt.s32.totalorder %s1185_s13, %s908_s26 }
  0x4b   : > { %p905_p12 = pnand %p903_p11, %p889_p3  ;;  %p911_p9 = scmp.lt.s32.totalorder %s909_s19, %s902_s27 }
  0x4d   : > { %p906_p0 = pneg %p905_p12  ;;  %p912_p1 = por %p911_p9, %p910_p5 }
  0x4f   : > { %p913_p2 = pnand %p912_p1, %p906_p0 }
  0x51   : > { %916 = shalt.err (!%p913_p2)
}
  0x52   : > { %793 = dma.hbm_to_vmem [thread:$0]  (!%p1189_p13), %s1182_s11, 128, %s1185_s13, %s196_s10  }
  0x53   : > { %s218_s2 = scalar_lea.vmem [#allocation6], %s1173_s6  ;;  %s215_s30 = scalar_lea.sflag [#allocation7], %s214_s9 }
  0x54   : > { %s226_s29 = sshll.u32 %s218_s2, 4  ;;  %s917_s12 = scalar_lea.hbm %s1196_s5, 128  ;;  %s227_s29 = int_to_ptr.vmem [resolvable:$true] %s226_s29 }
  0x55   : > { %p918_p7 = scmp.ne.s32.totalorder %s1196_s5, %s917_s12  ;;  %s922_s8 = scalar_lea.hbm %s1340_s1, 256 }
  0x56   : > { %p923_p8 = scmp.lt.u32.totalorder %s1196_s5, %s1340_s1  ;;  %p924_p11 = scmp.lt.u32.totalorder %s922_s8, %s917_s12 }
  0x57   : > { %p920_p4 = pnand %p918_p7, %p889_p3  ;;  %p926_p0 = scmp.lt.u32.totalorder %s917_s12, %s1196_s5 }
  0x58   : > { %p925_p12 = por %p924_p11, %p923_p8 }
  0x59   : > { %p921_p6 = pneg %p920_p4 }
  0x5a   : > { %p927_p5 = por %p926_p0, %p925_p12 }
  0x5c   : > { %p928_p9 = pnand %p927_p5, %p921_p6 }
  0x5e   : > { %931 = shalt.err (!%p928_p9)
}
  0x5f   : > { %s932_s6 = scalar_lea.vmem %s227_s29, 128  ;;  %s1043_s11 = smov [#allocation6]  }
  0x60   : > { %p933_p1 = scmp.ne.s32.totalorder %s227_s29, %s932_s6  ;;  %s937_s13 = sshll.u32 %s1043_s11, 4  ;;  %s938_s13 = int_to_ptr.vmem [resolvable:$false] %s937_s13 }
  0x61   : > { %s939_s9 = scalar_lea.vmem %s938_s13, 256  ;;  %p940_p4 = scmp.lt.s32.totalorder %s227_s29, %s938_s13 }
  0x62   : > { %p935_p2 = pnand %p933_p1, %p889_p3  ;;  %p941_p10 = scmp.lt.s32.totalorder %s939_s9, %s932_s6 }
  0x64   : > { %p936_p7 = pneg %p935_p2  ;;  %p942_p8 = por %p941_p10, %p940_p4 }
  0x66   : > { %p943_p11 = pnand %p942_p8, %p936_p7 }
  0x68   : > { %946 = shalt.err (!%p943_p11)
}
  0x69   : > { %796 = dma.hbm_to_vmem [thread:$0]  (!%p1189_p13), %s1196_s5, 128, %s227_s29, %s215_s30  }
  0x6a   : > { %p1362_p6 = scmp.ne.s32.totalorder %s1354_s25, 0 }
  0x6b   : > { %s1249_s10 = sand.u32 (!%p1362_p6), 1, %s1021_s16   ;;  %p1363_p10 = scmp.ne.s32.totalorder (!%p1362_p6), %s1352_s23, 0 }
  0x6c   : > { %235 = sbr.rel (%p1362_p6) target bundleno = 390 (0x186), region = 36  ;;  %s1252_s2 = sshll.u32 (!%p1362_p6), %s1249_s10, 3 }
  0x6d   : > { %s238_s12 = scalar_lea.sflag (!%p1362_p6), [#allocation4], %s1249_s10  ;;  %s241_s22 = scalar_lea.vmem (!%p1362_p6), [#allocation3], %s1252_s2 }
  0x73   : > { %1000 = dma.done.wait (%p1363_p10), %s238_s12, 128  }
  0x74   : > { %1002 = vsyncadd (%p1363_p10), %s238_s12, 4294967168  ;;  %s246_s25 = sand.u32 1, %s1104_s21   ;;  %s250_s5 = scalar_lea.vmem [#allocation6], %s1252_s2 }
  0x75   : > { %s247_s14 = scalar_lea.sflag [#allocation7], %s246_s25 }
  0x76   : > { %1004 = dma.done.wait (%p1363_p10), %s247_s14, 128  }
  0x77   : > { %1006 = vsyncadd (%p1363_p10), %s247_s14, 4294967168  ;;  %p1364_p13 = scmp.eq.s32.totalorder %s1104_s21, 0 }
  0x79   : > { %1008 = dma.done.wait (%p1364_p13), [#allocation7], 6144   ;;  %p1365_p3 = pmov %p1364_p13 }
  0x7a   : > { %v1044_v0 = vmov 0.0|0.0   ;;  %vm1045_vm0 = vmmov 0   ;;  %v1046_v1 = vmov 0.0   ;;  %v306_v2 = vld [vmem:[#allocation8 + $0x80] sm:$0xff]  ;;  %v307_v3 = vld [vmem:[#allocation8 + $0x88] sm:$0xff]  ;;  %v308_v7 = vld [vmem:[#allocation8 + $0x90] sm:$0xff] }
  0x7b   : > { %1010 = vsyncadd (%p1365_p3), [#allocation7], 4294961152  ;;  %752 = vmatprep.subr.bf16.mxu1 %v1044_v0  ;;  %717 = vmatprep.mubr.msk.f32.mxu1 %vm1045_vm0, %v1046_v1  ;;  %v290_v4 = vld [vmem:[#allocation8] sm:$0xff]  ;;  %v720_v5 = vpack.c.bf16 %v307_v3, %v306_v2  ;;  %v291_v6 = vld [vmem:[#allocation8 + $0x8] sm:$0xff]  ;;  %s630_s29 = sshll.u32 %s1029_s18, 7  ;;  %s283_s30 = scalar_lea.vmem [#allocation9], %s1252_s2 }
  0x7c   : > { %v309_v8 = vld [vmem:[#allocation8 + $0x98] sm:$0xff]  ;;  %v722_v9 = vpack.c.bf16 %v291_v6, %v290_v4  ;;  %v292_v11 = vld [vmem:[#allocation8 + $0x10] sm:$0xff]  ;;  %v322_v13 = vld [vmem:[#allocation8 + $0x100] sm:$0xff]  ;;  %s501_s27 = sshll.u32 %s283_s30, 4  ;;  %s1290_s19 = scalar_lea.hbm %s1343_s4, %s630_s29  ;;  %s1292_s27 = int_to_ptr.vmem [resolvable:$true] %s501_s27 }
  0x7d   : > { %v724_v10 = vpack.c.bf16 %v309_v8, %v308_v7  ;;  %v293_v12 = vld [vmem:[#allocation8 + $0x18] sm:$0xff]  ;;  %721 = vmatprep.subr.bf16.mxu0 %v720_v5  ;;  %v323_v14 = vld [vmem:[#allocation8 + $0x108] sm:$0xff]  ;;  %v310_v15 = vld [vmem:[#allocation8 + $0xa0] sm:$0xff]  ;;  %s487_s6 = scalar_lea.sflag [#allocation5], %s1249_s10  ;;  %s947_s11 = scalar_lea.vmem %s1292_s27, 128 }
  0x7e   : > { %v311_v16 = vld [vmem:[#allocation8 + $0xa8] sm:$0xff]  ;;  %723 = vmatpush3.bf16.msra.mxu0 %v722_v9  ;;  %v726_v17 = vpack.c.bf16 %v293_v12, %v292_v11  ;;  %v753_v18 = vpack.c.bf16 %v323_v14, %v322_v13  ;;  %v324_v19 = vld [vmem:[#allocation8 + $0x110] sm:$0xff]  ;;  %v294_v21 = vld [vmem:[#allocation8 + $0x20] sm:$0xff]  ;;  %p948_p12 = scmp.ne.s32.totalorder %s1292_s27, %s947_s11  ;;  %p1366_p0 = scmp.ne.s32.totalorder %s1360_s28, 0 }
  0x7f   : > { %725 = vmatprep.subr.bf16.mxu0 %v724_v10  ;;  %v728_v20 = vpack.c.bf16 %v311_v16, %v310_v15  ;;  %v295_v22 = vld [vmem:[#allocation8 + $0x28] sm:$0xff]  ;;  %v325_v23 = vld [vmem:[#allocation8 + $0x118] sm:$0xff]  ;;  %v312_v25 = vld [vmem:[#allocation8 + $0xb0] sm:$0xff]  ;;  %s1047_s18 = smov [#allocation9]  }
  0x80   : > { %754 = vmatpush3.bf16.msra.mxu1 %v753_v18  ;;  %v756_v24 = vpack.c.bf16 %v325_v23, %v324_v19  ;;  %v313_v26 = vld [vmem:[#allocation8 + $0xb8] sm:$0xff]  ;;  %v326_v27 = vld [vmem:[#allocation8 + $0x120] sm:$0xff]  ;;  %v327_v28 = vld [vmem:[#allocation8 + $0x128] sm:$0xff]  ;;  %v730_v29 = vpack.c.bf16 %v295_v22, %v294_v21  ;;  %p949_p5 = pnand %p948_p12, %p1366_p0  ;;  %s951_s13 = sshll.u32 %s1047_s18, 4  ;;  %s952_s13 = int_to_ptr.vmem [resolvable:$false] %s951_s13 }
  0x81   : > { %755 = vmatprep.subr.bf16.mxu1 %v1044_v0  ;;  %v732_v30 = vpack.c.bf16 %v313_v26, %v312_v25  ;;  %v296_v31 = vld [vmem:[#allocation8 + $0x30] sm:$0xff]  ;;  %v297_v32 = vld [vmem:[#allocation8 + $0x38] sm:$0xff]  ;;  %v759_v33 = vpack.c.bf16 %v327_v28, %v326_v27  ;;  %v314_v34 = vld [vmem:[#allocation8 + $0xc0] sm:$0xff]  ;;  %s953_s9 = scalar_lea.vmem %s952_s13, 256  ;;  %p954_p1 = scmp.lt.s32.totalorder %s1292_s27, %s952_s13 }
  0x82   : > { %727 = vmatpush3.bf16.msra.mxu0 %v726_v17  ;;  %v315_v35 = vld [vmem:[#allocation8 + $0xc8] sm:$0xff]  ;;  %v328_v36 = vld [vmem:[#allocation8 + $0x130] sm:$0xff]  ;;  %v329_v37 = vld [vmem:[#allocation8 + $0x138] sm:$0xff]  ;;  %v734_v38 = vpack.c.bf16 %v297_v32, %v296_v31  ;;  %p950_p9 = pneg %p949_p5  ;;  %p955_p2 = scmp.lt.s32.totalorder %s953_s9, %s947_s11 }
  0x83   : > { %729 = vmatprep.subr.bf16.mxu0 %v728_v20  ;;  %v736_v39 = vpack.c.bf16 %v315_v35, %v314_v34  ;;  %v298_v40 = vld [vmem:[#allocation8 + $0x40] sm:$0xff]  ;;  %v299_v41 = vld [vmem:[#allocation8 + $0x48] sm:$0xff]  ;;  %v762_v42 = vpack.c.bf16 %v329_v37, %v328_v36  ;;  %v316_v43 = vld [vmem:[#allocation8 + $0xd0] sm:$0xff] }
  0x84   : > { %757 = vmatpush3.bf16.msra.mxu1 %v756_v24  ;;  %v317_v44 = vld [vmem:[#allocation8 + $0xd8] sm:$0xff]  ;;  %v330_v45 = vld [vmem:[#allocation8 + $0x140] sm:$0xff]  ;;  %v331_v46 = vld [vmem:[#allocation8 + $0x148] sm:$0xff]  ;;  %v738_v49 = vpack.c.bf16 %v299_v41, %v298_v40  ;;  %p956_p7 = por %p955_p2, %p954_p1 }
  0x85   : > { %758 = vmatprep.subr.bf16.mxu1 %v1044_v0  ;;  %v284_v47 = vld [vmem:[%s241_s22] sm:$0xff]  ;;  %v285_v48 = vld [vmem:[%s250_s5] sm:$0xff]  ;;  %v740_v50 = vpack.c.bf16 %v317_v44, %v316_v43  ;;  %v765_v53 = vpack.c.bf16 %v331_v46, %v330_v45 }
  0x86   : > { %731 = vmatpush3.bf16.msra.mxu0 %v730_v29  ;;  %286 = vst [vmem:[#allocation2] sm:$0xff] %v285_v48  ;;  %287 = vst [vmem:[#allocation2 + $0x8] sm:$0xff] %v284_v47  ;;  %v300_v51 = vld [vmem:[#allocation8 + $0x50] sm:$0xff]  ;;  %v301_v52 = vld [vmem:[#allocation8 + $0x58] sm:$0xff]  ;;  %p957_p4 = pnand %p956_p7, %p950_p9 }
  0x87   : > { %733 = vmatprep.subr.bf16.mxu0 %v732_v30  ;;  %v318_v54 = vld [vmem:[#allocation8 + $0xe0] sm:$0xff]  ;;  %v319_v55 = vld [vmem:[#allocation8 + $0xe8] sm:$0xff]  ;;  %v332_v56 = vld [vmem:[#allocation8 + $0x150] sm:$0xff]  ;;  %v742_v58 = vpack.c.bf16 %v301_v52, %v300_v51 }
  0x88   : > { %760 = vmatpush3.bf16.msra.mxu1 %v759_v33  ;;  %v333_v57 = vld [vmem:[#allocation8 + $0x158] sm:$0xff]  ;;  %v744_v59 = vpack.c.bf16 %v319_v55, %v318_v54  ;;  %v302_v60 = vld [vmem:[#allocation8 + $0x60] sm:$0xff]  ;;  %v303_v61 = vld [vmem:[#allocation8 + $0x68] sm:$0xff] }
  0x89   : > { %761 = vmatprep.subr.bf16.mxu1 %v1044_v0  ;;  %v768_v62 = vpack.c.bf16 %v333_v57, %v332_v56  ;;  %v320_v63 = vld [vmem:[#allocation8 + $0xf0] sm:$0xff]  ;;  %v321_v1 = vld [vmem:[#allocation8 + $0xf8] sm:$0xff]  ;;  %v334_v2 = vld [vmem:[#allocation8 + $0x160] sm:$0xff]  ;;  %v746_v5 = vpack.c.bf16 %v303_v61, %v302_v60 }
  0x8a   : > { %735 = vmatpush3.bf16.msra.mxu0 %v734_v38  ;;  %v335_v3 = vld [vmem:[#allocation8 + $0x168] sm:$0xff]  ;;  %v748_v6 = vpack.c.bf16 %v321_v1, %v320_v63  ;;  %v304_v7 = vld [vmem:[#allocation8 + $0x70] sm:$0xff]  ;;  %v305_v8 = vld [vmem:[#allocation8 + $0x78] sm:$0xff] }
  0x8b   : > { %737 = vmatprep.subr.bf16.mxu0 %v736_v39  ;;  %v771_v9 = vpack.c.bf16 %v335_v3, %v334_v2  ;;  %v336_v10 = vld [vmem:[#allocation8 + $0x170] sm:$0xff]  ;;  %v337_v11 = vld [vmem:[#allocation8 + $0x178] sm:$0xff]  ;;  %v750_v12 = vpack.c.bf16 %v305_v8, %v304_v7 }
  0x8c   : > { %763 = vmatpush3.bf16.msra.mxu1 %v762_v42  ;;  %v774_v13 = vpack.c.bf16 %v337_v11, %v336_v10  ;;  %v628_v17 = vld [vmem:[%s1342_s3] ss:$0 sm:$0xff] }
  0x8d   : > { %764 = vmatprep.subr.bf16.mxu1 %v1044_v0  ;;  %v289_v4 = vld [vmem:[#allocation2 + $0x7] sm:$0xff] }
  0x8e   : > { %739 = vmatpush3.bf16.msra.mxu0 %v738_v49  ;;  %409 = vmatprep.mubr.f32.mxu0 %v289_v4  ;;  %v288_v14 = vld [vmem:[#allocation2 + $0x6] sm:$0xff] }
  0x8f   : > { %741 = vmatprep.subr.bf16.mxu0 %v740_v50 }
  0x90   : > { %766 = vmatpush3.bf16.msra.mxu1 %v765_v53 }
  0x91   : > { %767 = vmatprep.subr.bf16.mxu1 %v1044_v0 }
  0x92   : > { %743 = vmatpush3.bf16.msra.mxu0 %v742_v58 }
  0x93   : > { %745 = vmatprep.subr.bf16.mxu0 %v744_v59 }
  0x94   : > { %769 = vmatpush3.bf16.msra.mxu1 %v768_v62 }
  0x95   : > { %770 = vmatprep.subr.bf16.mxu1 %v1044_v0 }
  0x96   : > { %747 = vmatpush3.bf16.msra.mxu0 %v746_v5 }
  0x97   : > { %749 = vmatprep.subr.bf16.mxu0 %v748_v6 }
  0x98   : > { %772 = vmatpush3.bf16.msra.mxu1 %v771_v9 }
  0x99   : > { %773 = vmatprep.subr.bf16.mxu1 %v1044_v0 }
  0x9a   : > { %751 = vmatpush3.bf16.msra.mxu0 %v750_v12 }
  0x9c   : > { %775 = vmatpush3.bf16.msra.mxu1 %v774_v13 }
  0x9d   : > { %410 = vmatmul.mubr.f32.vlgmr.msra.gmra.mrb[0].mxu0 %v288_v14 }
  0x9f   : > { %718 = vmatmul.mubr.f32.vlgmr.msra.gmra.mrb[0].mxu1 %v284_v47 }
 0x170   : > { %v665_v15 = vpop.f32.mrb[0].mxu0 }
 0x171   : > { %v666_v16 = vpop.f32.mrb[1].mxu0 }
 0x172   : > { %v667_v18 = vadd.f32 %v666_v16, %v665_v15  ;;  %v481_v19 = vpop.f32.mrb[0].mxu1 }
 0x173   : > { %v719_v20 = vpop.f32.mrb[1].mxu1 }
 0x174   : > { %v412_v0 = vadd.f32 %v667_v18, %v628_v17 }
 0x176   : > { %v482_v21 = vadd.f32 %v481_v19, %v412_v0 }
 0x178   : > { %485 = vst [vmem:[%s283_s30] sm:$0xff] %v482_v21 }
 0x179   : > { %960 = shalt.err (!%p957_p4)
}
 0x17a   : > { %s961_s10 = scalar_lea.hbm %s1290_s19, 128  ;;  %s965_s22 = scalar_lea.hbm %s1343_s4, 256 }
 0x17b   : > { %p962_p8 = scmp.ne.s32.totalorder %s1290_s19, %s961_s10  ;;  %p966_p10 = scmp.lt.u32.totalorder %s1290_s19, %s1343_s4 }
 0x17c   : > { %p967_p13 = scmp.lt.u32.totalorder %s965_s22, %s961_s10  ;;  %p969_p12 = scmp.lt.u32.totalorder %s961_s10, %s1290_s19 }
 0x17d   : > { %p963_p11 = pnand %p962_p8, %p1366_p0 }
 0x17e   : > { %p968_p3 = por %p967_p13, %p966_p10 }
 0x17f   : > { %p964_p6 = pneg %p963_p11 }
 0x180   : > { %p970_p5 = por %p969_p12, %p968_p3 }
 0x182   : > { %p971_p9 = pnand %p970_p5, %p964_p6 }
 0x184   : > { %974 = shalt.err (!%p971_p9)
}
 0x185   : > { %784 = dma.vmem_to_hbm [thread:$0]  (%p1366_p0), %s1292_s27, 128, %s1290_s19, %s487_s6  }
 0x186 PF: > { %s513_s5 = sand.u32 1, %s1017_s15   ;;  %p1367_p1 = scmp.ne.s32.totalorder %s1353_s24, 0 }
 0x187   : > { %p1368_p2 = scmp.ge.s32.totalorder %s1037_s20, 2  ;;  %s514_s21 = scalar_lea.sflag [#allocation5], %s513_s5 }
 0x189   : > { %p798_p7 = pnand %p1368_p2, %p1367_p1 }
 0x18b   : > { %1012 = dma.done.wait (!%p798_p7), %s514_s21, 128  }
 0x18c   : > { %1014 = vsyncadd (!%p798_p7), %s514_s21, 4294967168  ;;  %s23_s20 = sadd.s32 1, %s1037_s20   ;;  %s1369_s18 = sld [smem:[#allocation14_spill]] }
 0x18d   : > { %p20_p4 = scmp.ge.s32.totalorder %s23_s20, 4   ;;  %s1370_s19 = sld [smem:[#allocation15_spill]] }
 0x18e   : > { %s1371_s15 = smov %s1021_s16  ;;  %s1372_s16 = smov %s1025_s17 }
 0x18f   : > { %s1373_s17 = smov %s1176_s7  ;;  %22 = sbr.rel (!%p20_p4) target bundleno = 10 (0xa), region = 98 }
 0x196   :  { %519 = vsyncpa [#allocation4], 1 }
 0x197   :  { %521 = vsyncpa [#allocation4 + $0x1], 1 }
 0x198   :  { %522 = vsyncpa [#allocation7], 1 }
 0x199   :  { %524 = vsyncpa [#allocation7 + $0x1], 1 }
 0x19a   :  { %525 = vsyncpa [#allocation5], 1 }
 0x19b   :  { %527 = vsyncpa [#allocation5 + $0x1], 1 }

</bundles_post_ra>
